<compile_context>
chip_gen: v7x
topology: tpu7x:2x2x1
jax: 0.10.0
libtpu: 0.0.40
codegen_flags: <defaults>
</compile_context>

<pallas_src>
import functools

import numpy as np

import jax
import jax.numpy as jnp
from jax import lax
from jax.experimental import pallas as pl
from jax.experimental.pallas import tpu as pltpu


_VMEM_BUDGET = 48 * 1024 * 1024   # headroom under v7x's 64 MiB VMEM
_W_TILE = 512                     # multiple of 128; only used for very wide images


@functools.lru_cache(maxsize=64)
def _bicubic_weight_matrix_np(in_size: int, out_size: int) -> np.ndarray:
    """(out_size, in_size) matrix reproducing PyTorch bicubic 1-D resampling
    (align_corners=False, a=-0.75, antialias=False, replicate edges)."""
    a = -0.75
    scale = in_size / out_size
    i = np.arange(out_size, dtype=np.float64)
    src = scale * (i + 0.5) - 0.5
    x0 = np.floor(src)
    t = src - x0

    def cc1(x):  # |x| <= 1
        return ((a + 2.0) * x - (a + 3.0)) * x * x + 1.0

    def cc2(x):  # 1 < |x| < 2
        return ((((x - 5.0) * x) + 8.0) * x - 4.0) * a

    w = np.stack([cc2(t + 1.0), cc1(t), cc1(1.0 - t), cc2(2.0 - t)], axis=1)  # (out, 4)
    idx = x0.astype(np.int64)[:, None] + np.arange(-1, 3, dtype=np.int64)[None, :]
    idx = np.clip(idx, 0, in_size - 1)  # edge replication
    mat = np.zeros((out_size, in_size), dtype=np.float64)
    rows = np.repeat(np.arange(out_size)[:, None], 4, axis=1)
    np.add.at(mat, (rows, idx), w)    # duplicate (clamped) taps sum, as in PyTorch
    return mat.astype(np.float32)


def _resize_pad_kernel(plane_ref, wh_ref, wwt_ref, out_ref, acc_ref, *,
                       ph, pw, oh, ow, fill, apply_mask):
    # plane_ref: (P, H, TW)  wh_ref: (S, H)  wwt_ref: (TW, S)
    # out_ref:   (P, S, S)   acc_ref: (P, S, S) f32
    kw = pl.program_id(1)

    @pl.when(kw == 0)
    def _():
        acc_ref[...] = jnp.zeros_like(acc_ref)

    wh = wh_ref[...]                       # (S, H), compute dtype
    wwt = wwt_ref[...]                     # (TW, S), compute dtype
    n_planes = plane_ref.shape[0]
    # Unrolled loop of 2-D MXU matmuls over the P planes of this block:
    # weights stay resident, inputs feed the MXU in their native (bf16) dtype.
    for i in range(n_planes):
        plane = plane_ref[i].astype(wh.dtype)                               # (H, TW)
        tmp = jnp.dot(wh, plane, preferred_element_type=jnp.float32)        # (S, TW)
        acc_ref[i] += jnp.dot(tmp.astype(wwt.dtype), wwt,
                              preferred_element_type=jnp.float32)           # (S, S)

    @pl.when(kw == pl.num_programs(1) - 1)
    def _():
        res = acc_ref[...]
        if apply_mask:
            s_h, s_w = out_ref.shape[1], out_ref.shape[2]
            r = lax.broadcasted_iota(jnp.int32, (s_h, 1), 0)
            c = lax.broadcasted_iota(jnp.int32, (1, s_w), 1)
            inside = (r >= ph) & (r < ph + oh) & (c >= pw) & (c < pw + ow)  # (S, S)
            res = jnp.where(inside[None], res, jnp.float32(fill))
        out_ref[...] = res.astype(out_ref.dtype)


def _choose_tiles(h, w, size, itemsize, nc):
    """Pick (planes-per-step P, W tile, padded W) to fit the VMEM budget."""
    if w <= 1024:
        tw, w_pad = w, w
    else:
        tw = _W_TILE
        w_pad = ((w + tw - 1) // tw) * tw
    # per-plane VMEM: double-buffered input tile + resident output + f32 accumulator
    per_plane = 2 * h * tw * itemsize + size * size * itemsize + size * size * 4
    weight_bytes = 2 * (size * h + tw * size) * 4   # (generous: f32, double-buffered)
    avail = max(_VMEM_BUDGET - weight_bytes, per_plane)
    p = int(max(1, min(8, nc, avail // per_plane)))
    return p, int(tw), int(w_pad)


def resize_max_size(img: jnp.ndarray, size: int, fill: float = 0.0) -> jnp.ndarray:
    """JAX/Pallas equivalent of ResizeMaxSize.forward for NCHW tensors."""
    n, c, h, w = img.shape
    scale = size / float(max(h, w))
    if scale == 1.0:
        return img

    oh = int(round(h * scale))
    ow = int(round(w * scale))
    hpad = size - oh
    wpad = size - ow
    ph, pw = hpad // 2, wpad // 2  # TF.pad([wpad//2, hpad//2, ...]) -> left/top pads

    # bf16 inputs stay bf16 into the MXU (f32 accumulation); everything else in f32.
    compute_dtype = jnp.bfloat16 if img.dtype == jnp.bfloat16 else jnp.float32

    nc = n * c
    p, tw, w_pad = _choose_tiles(h, w, size, img.dtype.itemsize, nc)
    nc_pad = ((nc + p - 1) // p) * p

    # Interpolation weights with the center-pad placement baked in (zero rows /
    # columns at the pad positions).  Built in numpy + lru_cache: no per-call
    # XLA preprocessing work.
    wh = _bicubic_weight_matrix_np(h, oh)                 # (oh, H)
    ww = _bicubic_weight_matrix_np(w, ow)                 # (ow, W)
    wh_full = np.zeros((size, h), np.float32)
    wh_full[ph:ph + oh, :] = wh                           # (S, H)
    wwt_full = np.zeros((w_pad, size), np.float32)        # zero rows for W padding too
    wwt_full[:w, pw:pw + ow] = ww.T                       # (Wp, S)
    wh_pad = jnp.asarray(wh_full, dtype=compute_dtype)
    wwt_pad = jnp.asarray(wwt_full, dtype=compute_dtype)

    planes = img.reshape(nc, h, w)
    if w_pad != w:
        planes = jnp.pad(planes, ((0, 0), (0, 0), (0, w_pad - w)))
    if nc_pad != nc:
        planes = jnp.pad(planes, ((0, nc_pad - nc), (0, 0), (0, 0)))

    kern = functools.partial(
        _resize_pad_kernel, ph=ph, pw=pw, oh=oh, ow=ow,
        fill=float(fill), apply_mask=(float(fill) != 0.0),
    )
    grid = (nc_pad // p, w_pad // tw)
    out = pl.pallas_call(
        kern,
        out_shape=jax.ShapeDtypeStruct((nc_pad, size, size), img.dtype),
        grid=grid,
        in_specs=[
            pl.BlockSpec((p, h, tw), lambda b, k: (b, 0, k)),
            pl.BlockSpec((size, h), lambda b, k: (0, 0)),
            pl.BlockSpec((tw, size), lambda b, k: (k, 0)),
        ],
        out_specs=pl.BlockSpec((p, size, size), lambda b, k: (b, 0, 0)),
        scratch_shapes=[pltpu.VMEM((p, size, size), jnp.float32)],
        compiler_params=pltpu.CompilerParams(
            dimension_semantics=("parallel", "arbitrary"),
            vmem_limit_bytes=64 * 1024 * 1024,
        ),
    )(planes, wh_pad, wwt_pad)

    return out[:nc].reshape(n, c, size, size)


if __name__ == "__main__":
    key = jax.random.PRNGKey(0)
    # Small NCHW image: N=2, C=3, H=16, W=20; target max-size = 12.
    N, C, H, W = 2, 3, 16, 20
    size = 12
    img = jax.random.uniform(key, (N, C, H, W), dtype=jnp.float32)

    out = resize_max_size(img, size, fill=0.0)
    out = jax.block_until_ready(out)

    assert out.shape == (N, C, size, size), out.shape
    assert out.dtype == img.dtype, out.dtype
    assert bool(jnp.all(jnp.isfinite(out)))

    # Light numerical check against a pure-numpy separable reference.
    scale = size / float(max(H, W))
    oh, ow = int(round(H * scale)), int(round(W * scale))
    ph, pw = (size - oh) // 2, (size - ow) // 2
    wh_np = _bicubic_weight_matrix_np(H, oh)
    ww_np = _bicubic_weight_matrix_np(W, ow)
    resized = np.einsum("oh,nchw,pw->ncop",
                        wh_np, np.asarray(img, np.float64), ww_np)
    ref = np.zeros((N, C, size, size), np.float64)
    ref[:, :, ph:ph + oh, pw:pw + ow] = resized
    err = np.abs(np.asarray(out, np.float64) - ref).max()
    assert err < 1e-4, err

    print("KERNEL_OK")
</pallas_src>

<mosaic_0001>
module attributes {stable_mosaic.version = 11 : i64} {
  func.func @_resize_pad_kernel(%arg0: i32, %arg1: i32, %arg2: memref<6x16x20xf32, #tpu.memory_space<vmem>>, %arg3: memref<12x16xf32, #tpu.memory_space<vmem>>, %arg4: memref<20x12xf32, #tpu.memory_space<vmem>>, %arg5: memref<6x12x12xf32, #tpu.memory_space<vmem>>, %arg6: memref<6x12x12xf32, #tpu.memory_space<vmem>>) attributes {dimension_semantics = [#tpu.dimension_semantics<parallel>, #tpu.dimension_semantics<arbitrary>], iteration_bounds = array<i64: 1, 1>, scalar_prefetch = 0 : i64, scratch_operands = 1 : i64, tpu.core_type = #tpu.core_type<tc>, window_params = [{transform_indices = @transform_0, window_bounds = array<i64: 6, 16, 20>}, {pipeline_mode = #tpu.pipeline_mode<synchronous>, transform_indices = @transform_1, window_bounds = array<i64: 12, 16>}, {transform_indices = @transform_2, window_bounds = array<i64: 20, 12>}, {transform_indices = @transform_3, window_bounds = array<i64: 6, 12, 12>}]} {
    %c0_i32 = arith.constant 0 : i32
    %0 = arith.cmpi eq, %arg1, %c0_i32 : i32
    %1 = arith.extui %0 : i1 to i32
    %c0_i32_0 = arith.constant 0 : i32
    %2 = arith.cmpi ne, %1, %c0_i32_0 : i32
    scf.if %2 {
      %cst_66 = arith.constant 0.000000e+00 : f32
      %68 = vector.broadcast %cst_66 : f32 to vector<6x12x12xf32>
      %c0_67 = arith.constant 0 : index
      %c0_68 = arith.constant 0 : index
      %c0_69 = arith.constant 0 : index
      %69 = vector.load %arg6[%c0_67, %c0_68, %c0_69] : memref<6x12x12xf32, #tpu.memory_space<vmem>>, vector<6x12x12xf32>
      tpu.vector_store %arg6[%c0_67, %c0_68, %c0_69], %68 {strides = array<i32>} : memref<6x12x12xf32, #tpu.memory_space<vmem>>, vector<6x12x12xf32>,
    } else {
    }
    %c0 = arith.constant 0 : index
    %c0_1 = arith.constant 0 : index
    %3 = vector.load %arg3[%c0, %c0_1] : memref<12x16xf32, #tpu.memory_space<vmem>>, vector<12x16xf32>
    %c0_2 = arith.constant 0 : index
    %c0_3 = arith.constant 0 : index
    %4 = vector.load %arg4[%c0_2, %c0_3] : memref<20x12xf32, #tpu.memory_space<vmem>>, vector<20x12xf32>
    %c0_4 = arith.constant 0 : index
    %c0_5 = arith.constant 0 : index
    %c0_6 = arith.constant 0 : index
    %5 = vector.load %arg2[%c0_4, %c0_5, %c0_6] : memref<6x16x20xf32, #tpu.memory_space<vmem>>, vector<1x16x20xf32>
    %6 = vector.shape_cast %5 : vector<1x16x20xf32> to vector<16x20xf32>
    %cst = arith.constant dense<0.000000e+00> : vector<12x20xf32>
    %7 = tpu.matmul %3, %6, %cst {dimension_numbers = #tpu.dot_dimension_numbers<[1], [0], [0], [1], [0, 0, 1, 1], [], []>} : vector<12x16xf32>, vector<16x20xf32>, vector<12x20xf32> -> vector<12x20xf32>
    %c0_7 = arith.constant 0 : index
    %c0_8 = arith.constant 0 : index
    %c0_9 = arith.constant 0 : index
    %8 = vector.load %arg6[%c0_7, %c0_8, %c0_9] : memref<6x12x12xf32, #tpu.memory_space<vmem>>, vector<1x12x12xf32>
    %9 = vector.shape_cast %8 : vector<1x12x12xf32> to vector<12x12xf32>
    %cst_10 = arith.constant dense<0.000000e+00> : vector<12x12xf32>
    %10 = tpu.matmul %7, %4, %cst_10 {dimension_numbers = #tpu.dot_dimension_numbers<[1], [0], [0], [1], [0, 0, 1, 1], [], []>} : vector<12x20xf32>, vector<20x12xf32>, vector<12x12xf32> -> vector<12x12xf32>
    %11 = arith.addf %9, %10 : vector<12x12xf32>
    %c0_11 = arith.constant 0 : index
    %c0_12 = arith.constant 0 : index
    %c0_13 = arith.constant 0 : index
    %12 = vector.load %arg6[%c0_11, %c0_12, %c0_13] : memref<6x12x12xf32, #tpu.memory_space<vmem>>, vector<1x12x12xf32>
    %13 = vector.shape_cast %12 : vector<1x12x12xf32> to vector<12x12xf32>
    %14 = vector.shape_cast %11 : vector<12x12xf32> to vector<1x12x12xf32>
    tpu.vector_store %arg6[%c0_11, %c0_12, %c0_13], %14 {strides = array<i32>} : memref<6x12x12xf32, #tpu.memory_space<vmem>>, vector<1x12x12xf32>,
    %c1 = arith.constant 1 : index
    %c0_14 = arith.constant 0 : index
    %c0_15 = arith.constant 0 : index
    %15 = vector.load %arg2[%c1, %c0_14, %c0_15] : memref<6x16x20xf32, #tpu.memory_space<vmem>>, vector<1x16x20xf32>
    %16 = vector.shape_cast %15 : vector<1x16x20xf32> to vector<16x20xf32>
    %cst_16 = arith.constant dense<0.000000e+00> : vector<12x20xf32>
    %17 = tpu.matmul %3, %16, %cst_16 {dimension_numbers = #tpu.dot_dimension_numbers<[1], [0], [0], [1], [0, 0, 1, 1], [], []>} : vector<12x16xf32>, vector<16x20xf32>, vector<12x20xf32> -> vector<12x20xf32>
    %c1_17 = arith.constant 1 : index
    %c0_18 = arith.constant 0 : index
    %c0_19 = arith.constant 0 : index
    %18 = vector.load %arg6[%c1_17, %c0_18, %c0_19] : memref<6x12x12xf32, #tpu.memory_space<vmem>>, vector<1x12x12xf32>
    %19 = vector.shape_cast %18 : vector<1x12x12xf32> to vector<12x12xf32>
    %cst_20 = arith.constant dense<0.000000e+00> : vector<12x12xf32>
    %20 = tpu.matmul %17, %4, %cst_20 {dimension_numbers = #tpu.dot_dimension_numbers<[1], [0], [0], [1], [0, 0, 1, 1], [], []>} : vector<12x20xf32>, vector<20x12xf32>, vector<12x12xf32> -> vector<12x12xf32>
    %21 = arith.addf %19, %20 : vector<12x12xf32>
    %c1_21 = arith.constant 1 : index
    %c0_22 = arith.constant 0 : index
    %c0_23 = arith.constant 0 : index
    %22 = vector.load %arg6[%c1_21, %c0_22, %c0_23] : memref<6x12x12xf32, #tpu.memory_space<vmem>>, vector<1x12x12xf32>
    %23 = vector.shape_cast %22 : vector<1x12x12xf32> to vector<12x12xf32>
    %24 = vector.shape_cast %21 : vector<12x12xf32> to vector<1x12x12xf32>
    tpu.vector_store %arg6[%c1_21, %c0_22, %c0_23], %24 {strides = array<i32>} : memref<6x12x12xf32, #tpu.memory_space<vmem>>, vector<1x12x12xf32>,
    %c2 = arith.constant 2 : index
    %c0_24 = arith.constant 0 : index
    %c0_25 = arith.constant 0 : index
    %25 = vector.load %arg2[%c2, %c0_24, %c0_25] : memref<6x16x20xf32, #tpu.memory_space<vmem>>, vector<1x16x20xf32>
    %26 = vector.shape_cast %25 : vector<1x16x20xf32> to vector<16x20xf32>
    %cst_26 = arith.constant dense<0.000000e+00> : vector<12x20xf32>
    %27 = tpu.matmul %3, %26, %cst_26 {dimension_numbers = #tpu.dot_dimension_numbers<[1], [0], [0], [1], [0, 0, 1, 1], [], []>} : vector<12x16xf32>, vector<16x20xf32>, vector<12x20xf32> -> vector<12x20xf32>
    %c2_27 = arith.constant 2 : index
    %c0_28 = arith.constant 0 : index
    %c0_29 = arith.constant 0 : index
    %28 = vector.load %arg6[%c2_27, %c0_28, %c0_29] : memref<6x12x12xf32, #tpu.memory_space<vmem>>, vector<1x12x12xf32>
    %29 = vector.shape_cast %28 : vector<1x12x12xf32> to vector<12x12xf32>
    %cst_30 = arith.constant dense<0.000000e+00> : vector<12x12xf32>
    %30 = tpu.matmul %27, %4, %cst_30 {dimension_numbers = #tpu.dot_dimension_numbers<[1], [0], [0], [1], [0, 0, 1, 1], [], []>} : vector<12x20xf32>, vector<20x12xf32>, vector<12x12xf32> -> vector<12x12xf32>
    %31 = arith.addf %29, %30 : vector<12x12xf32>
    %c2_31 = arith.constant 2 : index
    %c0_32 = arith.constant 0 : index
    %c0_33 = arith.constant 0 : index
    %32 = vector.load %arg6[%c2_31, %c0_32, %c0_33] : memref<6x12x12xf32, #tpu.memory_space<vmem>>, vector<1x12x12xf32>
    %33 = vector.shape_cast %32 : vector<1x12x12xf32> to vector<12x12xf32>
    %34 = vector.shape_cast %31 : vector<12x12xf32> to vector<1x12x12xf32>
    tpu.vector_store %arg6[%c2_31, %c0_32, %c0_33], %34 {strides = array<i32>} : memref<6x12x12xf32, #tpu.memory_space<vmem>>, vector<1x12x12xf32>,
    %c3 = arith.constant 3 : index
    %c0_34 = arith.constant 0 : index
    %c0_35 = arith.constant 0 : index
    %35 = vector.load %arg2[%c3, %c0_34, %c0_35] : memref<6x16x20xf32, #tpu.memory_space<vmem>>, vector<1x16x20xf32>
    %36 = vector.shape_cast %35 : vector<1x16x20xf32> to vector<16x20xf32>
    %cst_36 = arith.constant dense<0.000000e+00> : vector<12x20xf32>
    %37 = tpu.matmul %3, %36, %cst_36 {dimension_numbers = #tpu.dot_dimension_numbers<[1], [0], [0], [1], [0, 0, 1, 1], [], []>} : vector<12x16xf32>, vector<16x20xf32>, vector<12x20xf32> -> vector<12x20xf32>
    %c3_37 = arith.constant 3 : index
    %c0_38 = arith.constant 0 : index
    %c0_39 = arith.constant 0 : index
    %38 = vector.load %arg6[%c3_37, %c0_38, %c0_39] : memref<6x12x12xf32, #tpu.memory_space<vmem>>, vector<1x12x12xf32>
    %39 = vector.shape_cast %38 : vector<1x12x12xf32> to vector<12x12xf32>
    %cst_40 = arith.constant dense<0.000000e+00> : vector<12x12xf32>
    %40 = tpu.matmul %37, %4, %cst_40 {dimension_numbers = #tpu.dot_dimension_numbers<[1], [0], [0], [1], [0, 0, 1, 1], [], []>} : vector<12x20xf32>, vector<20x12xf32>, vector<12x12xf32> -> vector<12x12xf32>
    %41 = arith.addf %39, %40 : vector<12x12xf32>
    %c3_41 = arith.constant 3 : index
    %c0_42 = arith.constant 0 : index
    %c0_43 = arith.constant 0 : index
    %42 = vector.load %arg6[%c3_41, %c0_42, %c0_43] : memref<6x12x12xf32, #tpu.memory_space<vmem>>, vector<1x12x12xf32>
    %43 = vector.shape_cast %42 : vector<1x12x12xf32> to vector<12x12xf32>
    %44 = vector.shape_cast %41 : vector<12x12xf32> to vector<1x12x12xf32>
    tpu.vector_store %arg6[%c3_41, %c0_42, %c0_43], %44 {strides = array<i32>} : memref<6x12x12xf32, #tpu.memory_space<vmem>>, vector<1x12x12xf32>,
    %c4 = arith.constant 4 : index
    %c0_44 = arith.constant 0 : index
    %c0_45 = arith.constant 0 : index
    %45 = vector.load %arg2[%c4, %c0_44, %c0_45] : memref<6x16x20xf32, #tpu.memory_space<vmem>>, vector<1x16x20xf32>
    %46 = vector.shape_cast %45 : vector<1x16x20xf32> to vector<16x20xf32>
    %cst_46 = arith.constant dense<0.000000e+00> : vector<12x20xf32>
    %47 = tpu.matmul %3, %46, %cst_46 {dimension_numbers = #tpu.dot_dimension_numbers<[1], [0], [0], [1], [0, 0, 1, 1], [], []>} : vector<12x16xf32>, vector<16x20xf32>, vector<12x20xf32> -> vector<12x20xf32>
    %c4_47 = arith.constant 4 : index
    %c0_48 = arith.constant 0 : index
    %c0_49 = arith.constant 0 : index
    %48 = vector.load %arg6[%c4_47, %c0_48, %c0_49] : memref<6x12x12xf32, #tpu.memory_space<vmem>>, vector<1x12x12xf32>
    %49 = vector.shape_cast %48 : vector<1x12x12xf32> to vector<12x12xf32>
    %cst_50 = arith.constant dense<0.000000e+00> : vector<12x12xf32>
    %50 = tpu.matmul %47, %4, %cst_50 {dimension_numbers = #tpu.dot_dimension_numbers<[1], [0], [0], [1], [0, 0, 1, 1], [], []>} : vector<12x20xf32>, vector<20x12xf32>, vector<12x12xf32> -> vector<12x12xf32>
    %51 = arith.addf %49, %50 : vector<12x12xf32>
    %c4_51 = arith.constant 4 : index
    %c0_52 = arith.constant 0 : index
    %c0_53 = arith.constant 0 : index
    %52 = vector.load %arg6[%c4_51, %c0_52, %c0_53] : memref<6x12x12xf32, #tpu.memory_space<vmem>>, vector<1x12x12xf32>
    %53 = vector.shape_cast %52 : vector<1x12x12xf32> to vector<12x12xf32>
    %54 = vector.shape_cast %51 : vector<12x12xf32> to vector<1x12x12xf32>
    tpu.vector_store %arg6[%c4_51, %c0_52, %c0_53], %54 {strides = array<i32>} : memref<6x12x12xf32, #tpu.memory_space<vmem>>, vector<1x12x12xf32>,
    %c5 = arith.constant 5 : index
    %c0_54 = arith.constant 0 : index
    %c0_55 = arith.constant 0 : index
    %55 = vector.load %arg2[%c5, %c0_54, %c0_55] : memref<6x16x20xf32, #tpu.memory_space<vmem>>, vector<1x16x20xf32>
    %56 = vector.shape_cast %55 : vector<1x16x20xf32> to vector<16x20xf32>
    %cst_56 = arith.constant dense<0.000000e+00> : vector<12x20xf32>
    %57 = tpu.matmul %3, %56, %cst_56 {dimension_numbers = #tpu.dot_dimension_numbers<[1], [0], [0], [1], [0, 0, 1, 1], [], []>} : vector<12x16xf32>, vector<16x20xf32>, vector<12x20xf32> -> vector<12x20xf32>
    %c5_57 = arith.constant 5 : index
    %c0_58 = arith.constant 0 : index
    %c0_59 = arith.constant 0 : index
    %58 = vector.load %arg6[%c5_57, %c0_58, %c0_59] : memref<6x12x12xf32, #tpu.memory_space<vmem>>, vector<1x12x12xf32>
    %59 = vector.shape_cast %58 : vector<1x12x12xf32> to vector<12x12xf32>
    %cst_60 = arith.constant dense<0.000000e+00> : vector<12x12xf32>
    %60 = tpu.matmul %57, %4, %cst_60 {dimension_numbers = #tpu.dot_dimension_numbers<[1], [0], [0], [1], [0, 0, 1, 1], [], []>} : vector<12x20xf32>, vector<20x12xf32>, vector<12x12xf32> -> vector<12x12xf32>
    %61 = arith.addf %59, %60 : vector<12x12xf32>
    %c5_61 = arith.constant 5 : index
    %c0_62 = arith.constant 0 : index
    %c0_63 = arith.constant 0 : index
    %62 = vector.load %arg6[%c5_61, %c0_62, %c0_63] : memref<6x12x12xf32, #tpu.memory_space<vmem>>, vector<1x12x12xf32>
    %63 = vector.shape_cast %62 : vector<1x12x12xf32> to vector<12x12xf32>
    %64 = vector.shape_cast %61 : vector<12x12xf32> to vector<1x12x12xf32>
    tpu.vector_store %arg6[%c5_61, %c0_62, %c0_63], %64 {strides = array<i32>} : memref<6x12x12xf32, #tpu.memory_space<vmem>>, vector<1x12x12xf32>,
    %c0_i32_64 = arith.constant 0 : i32
    %65 = arith.cmpi eq, %arg1, %c0_i32_64 : i32
    %66 = arith.extui %65 : i1 to i32
    %c0_i32_65 = arith.constant 0 : i32
    %67 = arith.cmpi ne, %66, %c0_i32_65 : i32
    scf.if %67 {
      %c0_66 = arith.constant 0 : index
      %c0_67 = arith.constant 0 : index
      %c0_68 = arith.constant 0 : index
      %68 = vector.load %arg6[%c0_66, %c0_67, %c0_68] : memref<6x12x12xf32, #tpu.memory_space<vmem>>, vector<6x12x12xf32>
      %c0_69 = arith.constant 0 : index
      %c0_70 = arith.constant 0 : index
      %c0_71 = arith.constant 0 : index
      %69 = vector.load %arg5[%c0_69, %c0_70, %c0_71] : memref<6x12x12xf32, #tpu.memory_space<vmem>>, vector<6x12x12xf32>
      tpu.vector_store %arg5[%c0_69, %c0_70, %c0_71], %68 {strides = array<i32>} : memref<6x12x12xf32, #tpu.memory_space<vmem>>, vector<6x12x12xf32>,
    } else {
    }
    return
  }
  func.func @transform_0(%arg0: i32, %arg1: i32) -> (i32, i32, i32) {
    %c0_i32 = arith.constant 0 : i32
    %c0_i32_0 = arith.constant 0 : i32
    return %arg0, %c0_i32, %arg1 : i32, i32, i32
  }
  func.func @transform_1(%arg0: i32, %arg1: i32) -> (i32, i32) {
    %c0_i32 = arith.constant 0 : i32
    %c0_i32_0 = arith.constant 0 : i32
    %c0_i32_1 = arith.constant 0 : i32
    return %c0_i32, %c0_i32_0 : i32, i32
  }
  func.func @transform_2(%arg0: i32, %arg1: i32) -> (i32, i32) {
    %c0_i32 = arith.constant 0 : i32
    %c0_i32_0 = arith.constant 0 : i32
    return %arg1, %c0_i32 : i32, i32
  }
  func.func @transform_3(%arg0: i32, %arg1: i32) -> (i32, i32, i32) {
    %c0_i32 = arith.constant 0 : i32
    %c0_i32_0 = arith.constant 0 : i32
    %c0_i32_1 = arith.constant 0 : i32
    return %arg0, %c0_i32, %c0_i32_0 : i32, i32, i32
  }
}

</mosaic_0001>

<bundles_post_ra>
// kernel: tpu_custom_call.1
= control target key start
LH: loop header
LB: loop body
LE: loop exit
PB: predicated region body
PF: predicated region fallthrough
CT: control target
= control target key end

     0   :  { %8 = vsyncpa [#allocation4], 0  ;;  %s1671_s0 = inlined_call_operand.hbm [shape: f32[6,16,20], index: 0, kind: input, shape index: {}]   ;;  %s1672_s1 = inlined_call_operand.hbm [shape: f32[12,16], index: 1, kind: input, shape index: {}]   ;;  %s1673_s2 = inlined_call_operand.hbm [shape: f32[20,12], index: 2, kind: input, shape index: {}]   ;;  %s1674_s3 = inlined_call_operand.hbm [shape: f32[6,12,12], index: 3, kind: output, shape index: {}]  }
   0x1   :  { %9 = vsyncpa [#allocation7], 0 }
   0x2   :  { %10 = vsyncpa [#allocation5], 0  ;;  %s1461_s12 = smov [#allocation6]   ;;  %s1462_s14 = smov [#allocation3]  }
   0x3   :  { %s28_s13 = sshll.u32 %s1461_s12, 4  ;;  %s16_s15 = sshll.u32 %s1462_s14, 4  ;;  %s29_s13 = int_to_ptr.vmem [resolvable:$true] %s28_s13  ;;  %s1488_s15 = int_to_ptr.vmem [resolvable:$true] %s16_s15 }
   0x4   :  { %s1367_s18 = scalar_lea.hbm %s1672_s1, 256 }
   0x5   :  { %p1368_p0 = scmp.ne.s32.totalorder %s1672_s1, %s1367_s18  ;;  %p1371_p1 = scmp.lt.u32.totalorder %s1367_s18, %s1672_s1 }
   0x7   :  { %p1373_p2 = pnand %p1371_p1, %p1368_p0 }
   0x9   :  { %1376 = shalt.err (!%p1373_p2)
}
   0xa   :  { %s1377_s23 = scalar_lea.vmem %s29_s13, 256  ;;  %p1382_p4 = scmp.lt.s32.totalorder %s29_s13, %s29_s13 }
   0xb   :  { %p1378_p3 = scmp.ne.s32.totalorder %s29_s13, %s1377_s23  ;;  %p1383_p5 = scmp.lt.s32.totalorder %s1377_s23, %s1377_s23 }
   0xd   :  { %p1384_p6 = por %p1383_p5, %p1382_p4 }
   0xf   :  { %p1385_p7 = pnand %p1384_p6, %p1378_p3 }
  0x11   :  { %1388 = shalt.err (!%p1385_p7)
}
  0x12   :  { %s1463_s24 = smov 128   ;;  %s1464_s25 = smov 8  }
  0x13   :  { %34 = dma.hbm_to_vmem [thread:$0]  %s1672_s1, 256, %s29_s13, [#allocation7], %s1463_s24, %s1463_s24, %s1464_s25  }
  0x14   :  { %s1389_s30 = scalar_lea.hbm %s1671_s0, 1536 }
  0x15   :  { %p1390_p8 = scmp.ne.s32.totalorder %s1671_s0, %s1389_s30  ;;  %p1393_p9 = scmp.lt.u32.totalorder %s1389_s30, %s1671_s0 }
  0x17   :  { %p1395_p10 = pnand %p1393_p9, %p1390_p8 }
  0x19   :  { %1398 = shalt.err (!%p1395_p10)
}
  0x1a   :  { %s1399_s8 = scalar_lea.vmem %s1488_s15, 1536  ;;  %p1404_p12 = scmp.lt.s32.totalorder %s1488_s15, %s1488_s15 }
  0x1b   :  { %p1400_p11 = scmp.ne.s32.totalorder %s1488_s15, %s1399_s8  ;;  %p1405_p13 = scmp.lt.s32.totalorder %s1399_s8, %s1399_s8 }
  0x1d   :  { %p1406_p0 = por %p1405_p13, %p1404_p12 }
  0x1f   :  { %p1407_p1 = pnand %p1406_p0, %p1400_p11 }
  0x21   :  { %1410 = shalt.err (!%p1407_p1)
}
  0x22   :  { %22 = dma.hbm_to_vmem [thread:$0]  %s1671_s0, 1536, %s1488_s15, [#allocation4], %s1463_s24, %s1463_s24, %s1464_s25  }
  0x23   :  { %s1465_s10 = smov [#allocation8]   ;;  %s1411_s14 = scalar_lea.hbm %s1673_s2, 384 }
  0x24   :  { %s40_s11 = sshll.u32 %s1465_s10, 4  ;;  %p1412_p2 = scmp.ne.s32.totalorder %s1673_s2, %s1411_s14  ;;  %s41_s11 = int_to_ptr.vmem [resolvable:$true] %s40_s11 }
  0x25   :  { %p1415_p3 = scmp.lt.u32.totalorder %s1411_s14, %s1673_s2 }
  0x27   :  { %p1417_p4 = pnand %p1415_p3, %p1412_p2 }
  0x29   :  { %1420 = shalt.err (!%p1417_p4)
}
  0x2a   :  { %s1421_s20 = scalar_lea.vmem %s41_s11, 384  ;;  %p1426_p6 = scmp.lt.s32.totalorder %s41_s11, %s41_s11 }
  0x2b   :  { %p1422_p5 = scmp.ne.s32.totalorder %s41_s11, %s1421_s20  ;;  %p1427_p7 = scmp.lt.s32.totalorder %s1421_s20, %s1421_s20 }
  0x2d   :  { %p1428_p8 = por %p1427_p7, %p1426_p6 }
  0x2f   :  { %p1429_p9 = pnand %p1428_p8, %p1422_p5 }
  0x31   :  { %1432 = shalt.err (!%p1429_p9)
}
  0x32   :  { %46 = dma.hbm_to_vmem [thread:$0]  %s1673_s2, 384, %s41_s11, [#allocation7], %s1463_s24, %s1463_s24, %s1464_s25  }
  0x33   :  { %1455 = dma.done.wait [#allocation4], 1536  }
  0x34   :  { %1456 = vsyncadd [#allocation4], 4294965760 }
  0x35   :  { %1457 = dma.done.wait [#allocation7], 640  }
  0x36   :  { %1458 = vsyncadd [#allocation7], 4294966656  ;;  %vm81_vm0 = vcmask 130048   ;;  %v79_v0 = vld [vmem:[#allocation3] sm:$0xff]  ;;  %v80_v1 = vld [vmem:[#allocation3 + $0x8] sm:$0xff]  ;;  %vm172_vm1 = vcmask 1043456  }
  0x37   :  { %v1540_v2 = vld [vmem:[#allocation6] sm:$0xff]  ;;  %v1312_v3 = vpack.c.bf16 %v80_v1, %v79_v0  ;;  %v258_v4 = vld [vmem:[#allocation3 + $0x10] sm:$0xff]  ;;  %v259_v5 = vld [vmem:[#allocation3 + $0x18] sm:$0xff]  ;;  %vm62_vm2 = vcmask 93184   ;;  %v1466_v15 = vmov 0.0   ;;  %vm165_vm3 = vcmask 162816  }
  0x38   :  { %1220 = vmatprep.mubr.msk.f32.mxu0 %vm81_vm0, %v1540_v2  ;;  %v1320_v6 = vpack.c.bf16 %v259_v5, %v258_v4  ;;  %v76_v7 = vld [vmem:[#allocation8] sm:$0xff]  ;;  %v77_v8 = vld [vmem:[#allocation8 + $0x8] sm:$0xff]  ;;  %v1546_v10 = vld [vmem:[#allocation6 + $0x8] sm:$0xf]  ;;  %63 = vst.msk [vmem:[#allocation2 + $0x8] sm:$0xf] %vm62_vm2, %v1466_v15 }
  0x39   :  { %1313 = vmatprep.subr.bf16.mxu0 %v1312_v3  ;;  %v1544_v9 = vpack.c.bf16 %v77_v8, %v76_v7  ;;  %v1558_v11 = vld [vmem:[#allocation8 + $0x10] sm:$0xf]  ;;  %v425_v13 = vld [vmem:[#allocation3 + $0x28] sm:$0xff]  ;;  %65 = vst.msk [vmem:[#allocation2 + $0x18] sm:$0xf] %vm62_vm2, %v1466_v15  ;;  %v590_v18 = vld [vmem:[#allocation3 + $0x30] sm:$0xff] }
  0x3a   :  { %1315 = vmatpush3.bf16.msra.mxu0 %v1312_v3  ;;  %v424_v12 = vld [vmem:[#allocation3 + $0x20] sm:$0xff]  ;;  %67 = vst.msk [vmem:[#allocation2 + $0x28] sm:$0xf] %vm62_vm2, %v1466_v15  ;;  %69 = vst.msk [vmem:[#allocation2 + $0x38] sm:$0xf] %vm62_vm2, %v1466_v15  ;;  %v591_v19 = vld [vmem:[#allocation3 + $0x38] sm:$0xff] }
  0x3b   :  { %1321 = vmatprep.subr.bf16.mxu0 %v1320_v6  ;;  %1317 = vmatprep.subr.bf16.mxu1 %v1544_v9  ;;  %v1328_v14 = vpack.c.bf16 %v425_v13, %v424_v12  ;;  %71 = vst.msk [vmem:[#allocation2 + $0x48] sm:$0xf] %vm62_vm2, %v1466_v15  ;;  %73 = vst.msk [vmem:[#allocation2 + $0x58] sm:$0xf] %vm62_vm2, %v1466_v15  ;;  %v1336_v22 = vpack.c.bf16 %v591_v19, %v590_v18  ;;  %vm60_vm4 = vcmask 97280   ;;  %v756_v24 = vld [vmem:[#allocation3 + $0x40] sm:$0xff] }
  0x3c   :  { %1319 = vmatpush3.bf16.msra.mxu1 %v1544_v9  ;;  %61 = vst.msk [vmem:[#allocation2] sm:$0xff] %vm60_vm4, %v1466_v15  ;;  %64 = vst.msk [vmem:[#allocation2 + $0x10] sm:$0xff] %vm60_vm4, %v1466_v15  ;;  %v757_v25 = vld [vmem:[#allocation3 + $0x48] sm:$0xff]  ;;  %v922_v28 = vld [vmem:[#allocation3 + $0x50] sm:$0xff]  ;;  %s1467_s2 = smov [#allocation9]  }
  0x3d   :  { %1221 = vmatmul.mubr.msk.f32.vlgmr.msra.gmra.mrb[0].mxu0 %vm81_vm0, %v1546_v10  ;;  %1227 = vmatprep.subr.msk.mxu1 %vm172_vm1, %v1558_v11  ;;  %66 = vst.msk [vmem:[#allocation2 + $0x20] sm:$0xff] %vm60_vm4, %v1466_v15  ;;  %68 = vst.msk [vmem:[#allocation2 + $0x30] sm:$0xff] %vm60_vm4, %v1466_v15  ;;  %v1344_v27 = vpack.c.bf16 %v757_v25, %v756_v24  ;;  %v923_v29 = vld [vmem:[#allocation3 + $0x58] sm:$0xff]  ;;  %s1119_s21 = sshll.u32 %s1467_s2, 4  ;;  %s1120_s21 = int_to_ptr.vmem [resolvable:$true] %s1119_s21 }
  0x3e   :  { %1323 = vmatpush3.bf16.msra.mxu0 %v1320_v6  ;;  %1236 = vmatprep.mubr.msk.f32.mxu0 %vm81_vm0, %v1540_v2  ;;  %70 = vst.msk [vmem:[#allocation2 + $0x40] sm:$0xff] %vm60_vm4, %v1466_v15  ;;  %72 = vst.msk [vmem:[#allocation2 + $0x50] sm:$0xff] %vm60_vm4, %v1466_v15  ;;  %v1352_v30 = vpack.c.bf16 %v923_v29, %v922_v28  ;;  %s1433_s22 = scalar_lea.vmem %s1120_s21, 1536  ;;  %p1438_p11 = scmp.lt.s32.totalorder %s1120_s21, %s1120_s21 }
  0x3f   :  { %1329 = vmatprep.subr.bf16.mxu0 %v1328_v14  ;;  %v164_v31 = vld [vmem:[#allocation2 + $0x8] sm:$0xf]  ;;  %p1434_p10 = scmp.ne.s32.totalorder %s1120_s21, %s1433_s22  ;;  %p1439_p12 = scmp.lt.s32.totalorder %s1433_s22, %s1433_s22 }
  0x40   :  { %1228 = vmatpush3.msk.msra.mxu1 %vm172_vm1, %v1558_v11  ;;  %v337_v37 = vld [vmem:[#allocation2 + $0x18] sm:$0xf] }
  0x41   :  { %1237 = vmatmul.mubr.msk.f32.vlgmr.msra.gmra.mrb[2].mxu0 %vm81_vm0, %v1546_v10  ;;  %1325 = vmatprep.subr.bf16.mxu1 %v1544_v9  ;;  %v503_v49 = vld [vmem:[#allocation2 + $0x28] sm:$0xf]  ;;  %v669_v59 = vld [vmem:[#allocation2 + $0x38] sm:$0xf]  ;;  %p1440_p13 = por %p1439_p12, %p1438_p11 }
  0x42   :  { %1252 = vmatprep.mubr.msk.f32.mxu0 %vm81_vm0, %v1540_v2  ;;  %1331 = vmatpush3.bf16.msra.mxu0 %v1328_v14  ;;  %v835_v5 = vld [vmem:[#allocation2 + $0x48] sm:$0xf]  ;;  %v1001_v13 = vld [vmem:[#allocation2 + $0x58] sm:$0xf] }
  0x43   :  { %1333 = vmatprep.subr.bf16.mxu0 %v1544_v9  ;;  %v163_v32 = vld [vmem:[#allocation2] sm:$0xff]  ;;  %v336_v38 = vld [vmem:[#allocation2 + $0x10] sm:$0xff]  ;;  %p1441_p0 = pnand %p1440_p13, %p1434_p10 }
  0x44   :  { %v502_v50 = vld [vmem:[#allocation2 + $0x20] sm:$0xff]  ;;  %v668_v60 = vld [vmem:[#allocation2 + $0x30] sm:$0xff] }
  0x45   :  { %1253 = vmatmul.mubr.msk.f32.vlgmr.msra.gmra.mrb[4].mxu0 %vm81_vm0, %v1546_v10  ;;  %v834_v6 = vld [vmem:[#allocation2 + $0x40] sm:$0xff]  ;;  %v1000_v14 = vld [vmem:[#allocation2 + $0x50] sm:$0xff] }
  0x46   :  { %1335 = vmatpush3.bf16.msra.mxu0 %v1544_v9 }
  0x47   :  { %1259 = vmatprep.subr.msk.mxu0 %vm172_vm1, %v1558_v11 }
  0x4a   :  { %1260 = vmatpush3.msk.msra.mxu0 %vm172_vm1, %v1558_v11 }
  0x4b   :  { %1345 = vmatprep.subr.bf16.mxu0 %v1344_v27 }
 0x110   :  { %v1222_v16 = vpop.f32.mrb[0].mxu0 }
 0x111   :  { %v154_v17 = vpop.f32.mrb[1].mxu0 }
 0x112   :  { %1229 = vmatprep.mubr.msk.f32.mxu1 %vm165_vm3, %v154_v17 }
 0x113   :  { %1230 = vmatmul.mubr.msk.f32.vlgmr.msra.gmra.mrb[0].mxu1 %vm165_vm3, %v1222_v16 }
 0x114   :  { %1327 = vmatpush3.bf16.msra.mxu1 %v1544_v9  ;;  %v1238_v20 = vpop.f32.mrb[2].mxu0 }
 0x115   :  { %v326_v21 = vpop.f32.mrb[3].mxu0  ;;  %1243 = vmatprep.subr.msk.mxu1 %vm172_vm1, %v1558_v11 }
 0x116   :  { %1245 = vmatprep.mubr.msk.f32.mxu1 %vm165_vm3, %v326_v21 }
 0x118   :  { %1244 = vmatpush3.msk.msra.mxu1 %vm172_vm1, %v1558_v11  ;;  %v1254_v23 = vpop.f32.mrb[4].mxu0 }
 0x119   :  { %1246 = vmatmul.mubr.msk.f32.vlgmr.msra.gmra.mrb[2].mxu1 %vm165_vm3, %v1238_v20  ;;  %1337 = vmatprep.subr.bf16.mxu1 %v1336_v22  ;;  %v492_v26 = vpop.f32.mrb[5].mxu0 }
 0x11a   :  { %1339 = vmatpush3.bf16.msra.mxu1 %v1336_v22  ;;  %1268 = vmatprep.mubr.msk.f32.mxu1 %vm81_vm0, %v1540_v2 }
 0x11b   :  { %1341 = vmatprep.subr.bf16.mxu1 %v1544_v9  ;;  %1261 = vmatprep.mubr.msk.f32.mxu0 %vm165_vm3, %v492_v26 }
 0x11c   :  { %1262 = vmatmul.mubr.msk.f32.vlgmr.msra.gmra.mrb[6].mxu0 %vm165_vm3, %v1254_v23 }
 0x11d   :  { %1269 = vmatmul.mubr.msk.f32.vlgmr.msra.gmra.mrb[4].mxu1 %vm81_vm0, %v1546_v10  ;;  %1347 = vmatpush3.bf16.msra.mxu0 %v1344_v27 }
 0x11e   :  { %1343 = vmatpush3.bf16.msra.mxu1 %v1544_v9  ;;  %1284 = vmatprep.mubr.msk.f32.mxu0 %vm81_vm0, %v1540_v2 }
 0x11f   :  { %1275 = vmatprep.subr.msk.mxu1 %vm172_vm1, %v1558_v11  ;;  %1349 = vmatprep.subr.bf16.mxu0 %v1544_v9 }
 0x120   :  { %1285 = vmatmul.mubr.msk.f32.vlgmr.msra.gmra.mrb[8].mxu0 %vm81_vm0, %v1546_v10 }
 0x121   :  { %1351 = vmatpush3.bf16.msra.mxu0 %v1544_v9 }
 0x122   :  { %1276 = vmatpush3.msk.msra.mxu1 %vm172_vm1, %v1558_v11  ;;  %1291 = vmatprep.subr.msk.mxu0 %vm172_vm1, %v1558_v11 }
 0x123   :  { %1353 = vmatprep.subr.bf16.mxu1 %v1352_v30 }
 0x125   :  { %1292 = vmatpush3.msk.msra.mxu0 %vm172_vm1, %v1558_v11 }
 0x1e6   :  { %v1231_v33 = vpop.f32.mrb[0].mxu1 }
 0x1e7   :  { %v252_v34 = vadd.f32 %v1231_v33, %v164_v31  ;;  %v242_v35 = vpop.f32.mrb[1].mxu1 }
 0x1e8   :  { %v251_v36 = vadd.f32 %v242_v35, %v163_v32 }
 0x1e9   :  { %256 = vst.msk [vmem:[#allocation2 + $0x8] sm:$0xf] %vm62_vm2, %v252_v34 }
 0x1ea   :  { %254 = vst.msk [vmem:[#allocation2] sm:$0xff] %vm60_vm4, %v251_v36 }
 0x1ec   :  { %v1247_v39 = vpop.f32.mrb[2].mxu1 }
 0x1ed   :  { %v420_v40 = vadd.f32 %v1247_v39, %v337_v37  ;;  %v410_v41 = vpop.f32.mrb[3].mxu1 }
 0x1ee   :  { %v419_v42 = vadd.f32 %v410_v41, %v336_v38 }
 0x1ef   :  { %422 = vst.msk [vmem:[#allocation2 + $0x18] sm:$0xf] %vm62_vm2, %v420_v40  ;;  %v1263_v51 = vpop.f32.mrb[6].mxu0 }
 0x1f0   :  { %v1091_v43 = vld [vmem:[#allocation2 + $0x8] sm:$0xf]  ;;  %421 = vst.msk [vmem:[#allocation2 + $0x10] sm:$0xff] %vm60_vm4, %v419_v42  ;;  %v1270_v44 = vpop.f32.mrb[4].mxu1  ;;  %v586_v52 = vadd.f32 %v1263_v51, %v503_v49  ;;  %v576_v53 = vpop.f32.mrb[7].mxu0 }
 0x1f1   :  { %1103 = vst.msk [vmem:[#allocation9 + $0x8] sm:$0xf] %vm62_vm2, %v1091_v43  ;;  %v1090_v45 = vld [vmem:[#allocation2] sm:$0xff]  ;;  %v658_v46 = vpop.f32.mrb[5].mxu1  ;;  %v585_v54 = vadd.f32 %v576_v53, %v502_v50 }
 0x1f2   :  { %1102 = vst.msk [vmem:[#allocation9] sm:$0xff] %vm60_vm4, %v1090_v45  ;;  %1277 = vmatprep.mubr.msk.f32.mxu1 %vm165_vm3, %v658_v46 }
 0x1f3   :  { %1278 = vmatmul.mubr.msk.f32.vlgmr.msra.gmra.mrb[6].mxu1 %vm165_vm3, %v1270_v44  ;;  %588 = vst.msk [vmem:[#allocation2 + $0x28] sm:$0xf] %vm62_vm2, %v586_v52  ;;  %v1286_v55 = vpop.f32.mrb[8].mxu0 }
 0x1f4   :  { %1355 = vmatpush3.bf16.msra.mxu1 %v1352_v30  ;;  %1300 = vmatprep.mubr.msk.f32.mxu1 %vm81_vm0, %v1540_v2  ;;  %587 = vst.msk [vmem:[#allocation2 + $0x20] sm:$0xff] %vm60_vm4, %v585_v54  ;;  %v824_v56 = vpop.f32.mrb[9].mxu0 }
 0x1f5   :  { %1357 = vmatprep.subr.bf16.mxu1 %v1544_v9  ;;  %1293 = vmatprep.mubr.msk.f32.mxu0 %vm165_vm3, %v824_v56 }
 0x1f6   :  { %v1093_v47 = vld [vmem:[#allocation2 + $0x18] sm:$0xf]  ;;  %1294 = vmatmul.mubr.msk.f32.vlgmr.msra.gmra.mrb[10].mxu0 %vm165_vm3, %v1286_v55 }
 0x1f7   :  { %1105 = vst.msk [vmem:[#allocation9 + $0x18] sm:$0xf] %vm62_vm2, %v1093_v47  ;;  %v1092_v48 = vld [vmem:[#allocation2 + $0x10] sm:$0xff]  ;;  %1301 = vmatmul.mubr.msk.f32.vlgmr.msra.gmra.mrb[8].mxu1 %vm81_vm0, %v1546_v10 }
 0x1f8   :  { %1104 = vst.msk [vmem:[#allocation9 + $0x10] sm:$0xff] %vm60_vm4, %v1092_v48  ;;  %1359 = vmatpush3.bf16.msra.mxu1 %v1544_v9 }
 0x1f9   :  { %1307 = vmatprep.subr.msk.mxu1 %vm172_vm1, %v1558_v11 }
 0x1fa   :  { %v1095_v57 = vld [vmem:[#allocation2 + $0x28] sm:$0xf] }
 0x1fb   :  { %1107 = vst.msk [vmem:[#allocation9 + $0x28] sm:$0xf] %vm62_vm2, %v1095_v57  ;;  %v1094_v58 = vld [vmem:[#allocation2 + $0x20] sm:$0xff] }
 0x1fc   :  { %1308 = vmatpush3.msk.msra.mxu1 %vm172_vm1, %v1558_v11  ;;  %1106 = vst.msk [vmem:[#allocation9 + $0x20] sm:$0xff] %vm60_vm4, %v1094_v58 }
 0x2c6   :  { %v1279_v61 = vpop.f32.mrb[6].mxu1 }
 0x2c7   :  { %v752_v62 = vadd.f32 %v1279_v61, %v669_v59  ;;  %v742_v63 = vpop.f32.mrb[7].mxu1 }
 0x2c8   :  { %v751_v0 = vadd.f32 %v742_v63, %v668_v60 }
 0x2c9   :  { %754 = vst.msk [vmem:[#allocation2 + $0x38] sm:$0xf] %vm62_vm2, %v752_v62  ;;  %v1295_v7 = vpop.f32.mrb[10].mxu0 }
 0x2ca   :  { %753 = vst.msk [vmem:[#allocation2 + $0x30] sm:$0xff] %vm60_vm4, %v751_v0  ;;  %v1302_v1 = vpop.f32.mrb[8].mxu1  ;;  %v918_v8 = vadd.f32 %v1295_v7, %v835_v5  ;;  %v908_v9 = vpop.f32.mrb[11].mxu0 }
 0x2cb   :  { %v990_v2 = vpop.f32.mrb[9].mxu1  ;;  %v917_v10 = vadd.f32 %v908_v9, %v834_v6 }
 0x2cc   :  { %1309 = vmatprep.mubr.msk.f32.mxu1 %vm165_vm3, %v990_v2  ;;  %920 = vst.msk [vmem:[#allocation2 + $0x48] sm:$0xf] %vm62_vm2, %v918_v8 }
 0x2cd   :  { %1310 = vmatmul.mubr.msk.f32.vlgmr.msra.gmra.mrb[10].mxu1 %vm165_vm3, %v1302_v1  ;;  %919 = vst.msk [vmem:[#allocation2 + $0x40] sm:$0xff] %vm60_vm4, %v917_v10 }
 0x2d0   :  { %v1097_v3 = vld [vmem:[#allocation2 + $0x38] sm:$0xf] }
 0x2d1   :  { %1109 = vst.msk [vmem:[#allocation9 + $0x38] sm:$0xf] %vm62_vm2, %v1097_v3  ;;  %v1096_v4 = vld [vmem:[#allocation2 + $0x30] sm:$0xff] }
 0x2d2   :  { %1108 = vst.msk [vmem:[#allocation9 + $0x30] sm:$0xff] %vm60_vm4, %v1096_v4 }
 0x2d3   :  { %v1099_v11 = vld [vmem:[#allocation2 + $0x48] sm:$0xf] }
 0x2d4   :  { %1111 = vst.msk [vmem:[#allocation9 + $0x48] sm:$0xf] %vm62_vm2, %v1099_v11  ;;  %v1098_v12 = vld [vmem:[#allocation2 + $0x40] sm:$0xff] }
 0x2d5   :  { %1110 = vst.msk [vmem:[#allocation9 + $0x40] sm:$0xff] %vm60_vm4, %v1098_v12 }
 0x3a0   :  { %v1311_v15 = vpop.f32.mrb[10].mxu1 }
 0x3a1   :  { %v1084_v16 = vadd.f32 %v1311_v15, %v1001_v13  ;;  %v1074_v17 = vpop.f32.mrb[11].mxu1 }
 0x3a2   :  { %v1083_v18 = vadd.f32 %v1074_v17, %v1000_v14 }
 0x3a3   :  { %1086 = vst.msk [vmem:[#allocation2 + $0x58] sm:$0xf] %vm62_vm2, %v1084_v16 }
 0x3a4   :  { %1085 = vst.msk [vmem:[#allocation2 + $0x50] sm:$0xff] %vm60_vm4, %v1083_v18 }
 0x3aa   :  { %v1101_v19 = vld [vmem:[#allocation2 + $0x58] sm:$0xf] }
 0x3ab   :  { %1113 = vst.msk [vmem:[#allocation9 + $0x58] sm:$0xf] %vm62_vm2, %v1101_v19  ;;  %v1100_v20 = vld [vmem:[#allocation2 + $0x50] sm:$0xff] }
 0x3ac   :  { %1112 = vst.msk [vmem:[#allocation9 + $0x50] sm:$0xff] %vm60_vm4, %v1100_v20 }
 0x3ad   :  { %1444 = shalt.err (!%p1441_p0)
}
 0x3ae   :  { %s1445_s27 = scalar_lea.hbm %s1674_s3, 1536 }
 0x3af   :  { %p1446_p1 = scmp.ne.s32.totalorder %s1674_s3, %s1445_s27  ;;  %p1449_p2 = scmp.lt.u32.totalorder %s1445_s27, %s1674_s3 }
 0x3b1   :  { %p1451_p3 = pnand %p1449_p2, %p1446_p1 }
 0x3b3   :  { %1454 = shalt.err (!%p1451_p3)
}
 0x3b4   :  { %1125 = dma.vmem_to_hbm [thread:$0]  %s1120_s21, 1536, %s1674_s3, [#allocation5], %s1463_s24, %s1463_s24, %s1464_s25  }
 0x3b5   :  { %1459 = dma.done.wait [#allocation5], 1536  }
 0x3b6   :  { %1460 = vsyncadd [#allocation5], 4294965760 }
 0x3b7   :  { %1129 = vsyncpa [#allocation4], 1 }
 0x3b8   :  { %1130 = vsyncpa [#allocation7], 1 }
 0x3b9   :  { %1131 = vsyncpa [#allocation5], 1 }

</bundles_post_ra>
